<compile_context>
chip_gen: v5e
topology: v5e:2x2
jax: 0.10.0
libtpu: 0.0.40
codegen_flags: <defaults>
</compile_context>

<pallas_src>
import functools

import jax
import jax.numpy as jnp
import numpy as np
from jax.experimental import pallas as pl
from jax.experimental.pallas import tpu as pltpu


# ---------------------------------------------------------------------------
# helpers
# ---------------------------------------------------------------------------

def get_sinusoid_encoding_table(n_position, d_hid, padding_idx=None):
    """Sinusoid position encoding table (matches the PyTorch helper)."""
    def cal_angle(position, hid_idx):
        return position / np.power(10000, 2 * (hid_idx // 2) / d_hid)
    tbl = np.array([[cal_angle(pos, j) for j in range(d_hid)]
                    for pos in range(n_position)], dtype=np.float64)
    tbl[:, 0::2] = np.sin(tbl[:, 0::2])
    tbl[:, 1::2] = np.cos(tbl[:, 1::2])
    if padding_idx is not None:
        tbl[padding_idx] = 0.0
    return jnp.asarray(tbl, jnp.float32)


def _vmem_limit_bytes():
    """Explicit scoped-VMEM limit: 90% of physical capacity (64 MiB on v7x, 128 MiB on
    v5e/v6e), clamped; falls back to a conservative 64 MiB if the query is unavailable."""
    try:
        cap = int(pltpu.get_tpu_info().vmem_capacity_bytes)
    except Exception:
        cap = 64 * 1024 * 1024
    return max(32 * 1024 * 1024, min(int(cap * 0.9), 112 * 1024 * 1024))


_VMEM_LIMIT_BYTES = _vmem_limit_bytes()


def _const_index_map(ndim):
    return lambda *args, _n=ndim: (0,) * _n


def _const_spec(shape):
    """Grid-invariant block (weights): constant index_map; single-buffered if supported
    (the block is never re-fetched, so a second pipeline buffer is pure VMEM waste)."""
    try:
        return pl.BlockSpec(shape, _const_index_map(len(shape)),
                            pipeline_mode=pl.Buffered(1))
    except Exception:  # older/newer API without pipeline_mode: plain double-buffered spec
        return pl.BlockSpec(shape, _const_index_map(len(shape)))


def _use_lane_dense_slab(seq, d, bt, batch):
    """Write outputs as a lane-dense (B, seq*d) slab when d is not lane-aligned
    (avoids masked vst.msk partial stores) and the BlockSpec stays (8,128)-legal."""
    return (d % 128 != 0) and ((seq * d) % 128 == 0) and (bt % 8 == 0 or bt == batch)


def _divisor_block_b(batch, seq, target_rows=256):
    """Largest divisor of batch whose bt*seq is ~target_rows (used by the cheap embed)."""
    target = max(1, min(batch, target_rows // max(seq, 1)))
    for bt in range(target, 0, -1):
        if batch % bt == 0:
            return bt
    return 1


def _pick_block_b(batch, lq, lk, lqm, d_model, d_ff, n_head, d_k, d_v, compute_dtype,
                  target_rows=256):
    """Batch elements per decoder grid step: target ~256 MXU M-rows (256-wide MXU on
    v6e/v7x; also fine on v5e), clipped so the per-step working set fits the VMEM budget.
    The caller pads the batch to a multiple of the returned bt (no silent bt=1 cliff)."""
    w_item = jnp.dtype(compute_dtype).itemsize

    def est_bytes(bt):
        rows_q, rows_k = bt * lq, bt * lk
        act = 4 * (2 * rows_q * d_model + rows_k * d_model + rows_q * d_ff)
        qkv = (4 + w_item) * (rows_q * n_head * d_k + rows_k * n_head * (d_k + d_v))
        scores = 4 * n_head * bt * lq * lk * 2                      # scores + probs (f32)
        io = 2 * (4 * bt * lq * d_model * 2 + 4 * bt * lk * d_model + 2 * bt * lqm * lk)
        wgt = w_item * (2 * n_head * d_k * d_model + 2 * n_head * d_v * d_model
                        + 2 * d_model * d_ff)
        return act + qkv + scores + io + wgt

    budget = int(0.5 * _VMEM_LIMIT_BYTES)
    bt = max(1, min(batch, max(1, target_rows // max(lq, 1))))
    while bt > 1 and est_bytes(bt) > budget:
        bt -= 1
    return bt


def _compiler_params():
    return pltpu.CompilerParams(dimension_semantics=("parallel",),
                                vmem_limit_bytes=_VMEM_LIMIT_BYTES)


# ---------------------------------------------------------------------------
# embedding kernel:  out = x @ W + b [+ pos]     (enc_emb / tgt_emb + positional)
# ---------------------------------------------------------------------------

def embed_kernel(*refs, compute_dtype, has_pos, out_slab):
    idx = 0
    x_ref = refs[idx]; idx += 1
    pos_ref = None
    if has_pos:
        pos_ref = refs[idx]; idx += 1
    w_ref, b_ref, out_ref = refs[idx:idx + 3]

    bt, seq, d_in = x_ref.shape
    d_out = w_ref.shape[1]
    x2 = x_ref[...].astype(compute_dtype).reshape(bt * seq, d_in)
    y = jnp.dot(x2, w_ref[...], preferred_element_type=jnp.float32) + b_ref[...]
    y = y.reshape(bt, seq, d_out)
    if has_pos:
        y = y + pos_ref[...].astype(jnp.float32)      # (1,seq,d) or (bt,seq,d) broadcast
    if out_slab:
        out_ref[...] = y.reshape(bt, seq * d_out).astype(out_ref.dtype)
    else:
        out_ref[...] = y.astype(out_ref.dtype)


def embed(x, pos, w, b, *, compute_dtype):
    """x: (B, L, d_in); pos: None, (1, L, d_out) (constant) or (B, L, d_out)."""
    batch, seq, d_in = x.shape
    d_out = w.shape[1]
    bt = _divisor_block_b(batch, seq)
    has_pos = pos is not None
    out_slab = _use_lane_dense_slab(seq, d_out, bt, batch)

    operands = [x]
    in_specs = [pl.BlockSpec((bt, seq, d_in), lambda i: (i, 0, 0))]
    if has_pos:
        operands.append(pos)
        if pos.shape[0] == 1:
            in_specs.append(_const_spec((1, seq, d_out)))          # resident, single copy
        else:
            in_specs.append(pl.BlockSpec((bt, seq, d_out), lambda i: (i, 0, 0)))
    operands += [w.astype(compute_dtype), b]                       # bf16 weight on MXU path
    in_specs += [_const_spec((d_in, d_out)), _const_spec((1, d_out))]

    if out_slab:
        out_spec = pl.BlockSpec((bt, seq * d_out), lambda i: (i, 0))
        out_shape = jax.ShapeDtypeStruct((batch, seq * d_out), jnp.float32)
    else:
        out_spec = pl.BlockSpec((bt, seq, d_out), lambda i: (i, 0, 0))
        out_shape = jax.ShapeDtypeStruct((batch, seq, d_out), jnp.float32)

    out = pl.pallas_call(
        functools.partial(embed_kernel, compute_dtype=compute_dtype,
                          has_pos=has_pos, out_slab=out_slab),
        grid=(batch // bt,),
        in_specs=in_specs,
        out_specs=out_spec,
        out_shape=out_shape,
        compiler_params=_compiler_params(),
    )(*operands)
    if out_slab:
        out = out.reshape(batch, seq, d_out)                       # free metadata reshape
    return out


# ---------------------------------------------------------------------------
# fused DecoderLayer kernel (cross-attention MHA + FFN, both LayerNorms)
# ---------------------------------------------------------------------------

def decoder_layer_kernel(*refs, n_head, d_k, d_v, eps, has_mask, return_attn,
                         compute_dtype, out_slab):
    idx = 0
    tgt_ref = refs[idx]; idx += 1           # (Bt, Lq, D)  query side (residual)
    src_ref = refs[idx]; idx += 1           # (Bt, Lk, D)  key/value side
    mask_ref = None
    if has_mask:
        mask_ref = refs[idx]; idx += 1      # (Bt, Lqm, Lk) bf16 {0,1}, >0 => masked
    (wq_ref, bq_ref, wk_ref, bk_ref, wv_ref, bv_ref,
     wfc_ref, bfc_ref, g1_ref, be1_ref,
     w1_ref, b1_ref, w2_ref, b2_ref, g2_ref, be2_ref) = refs[idx:idx + 16]
    idx += 16
    out_ref = refs[idx]; idx += 1           # (Bt, Lq, D) or lane-dense (Bt, Lq*D)
    attn_ref = refs[idx] if return_attn else None   # (n_head, Bt, Lq, Lk) head-major

    bt, lq, d_model = tgt_ref.shape
    lk = src_ref.shape[1]
    cdt = compute_dtype
    f32 = jnp.float32

    t2 = tgt_ref[...].astype(f32).reshape(bt * lq, d_model)
    s2 = src_ref[...].astype(f32).reshape(bt * lk, d_model)

    # QKV projections on (Bt*L, D) rows.  Weights arrive pre-cast to compute_dtype
    # (no per-step cast); 1/sqrt(d_k) is folded into q once.
    scale = jnp.float32(1.0 / np.sqrt(d_k))
    q2 = (jnp.dot(t2.astype(cdt), wq_ref[...],
                  preferred_element_type=f32) + bq_ref[...]) * scale
    k2 = jnp.dot(s2.astype(cdt), wk_ref[...], preferred_element_type=f32) + bk_ref[...]
    v2 = jnp.dot(s2.astype(cdt), wv_ref[...], preferred_element_type=f32) + bv_ref[...]

    q3 = q2.astype(cdt).reshape(bt, lq, n_head * d_k)
    k3 = k2.astype(cdt).reshape(bt, lk, n_head * d_k)
    v3 = v2.astype(cdt).reshape(bt, lk, n_head * d_v)

    # Head-major (n_head*Bt, L, d) via static lane slices + leading-axis concat
    # (register-level rearrange; no VMEM scratch, no stores).
    qh = jnp.concatenate([q3[:, :, h * d_k:(h + 1) * d_k] for h in range(n_head)], axis=0)
    kh = jnp.concatenate([k3[:, :, h * d_k:(h + 1) * d_k] for h in range(n_head)], axis=0)
    vh = jnp.concatenate([v3[:, :, h * d_v:(h + 1) * d_v] for h in range(n_head)], axis=0)

    # One batched MXU matmul for all heads' scores: (n_head*Bt, Lq, Lk), f32 accumulate.
    s = jnp.einsum('bqd,bkd->bqk', qh, kh, preferred_element_type=f32)

    if has_mask:
        masked = mask_ref[...] > 0                              # (Bt, Lqm, Lk)
        s4 = s.reshape(n_head, bt, lq, lk)
        s = jnp.where(masked[None], jnp.float32(-1e30), s4).reshape(n_head * bt, lq, lk)

    # Single fused softmax over all heads (f32 math).
    m = jnp.max(s, axis=-1, keepdims=True)
    p = jnp.exp(s - m)
    denom = jnp.sum(p, axis=-1, keepdims=True)
    if cdt == jnp.float32:
        a = p / denom                                           # exact (validation path)
    else:
        a = p * pl.reciprocal(denom, approx=True)               # EUP recip, off VALU path

    if return_attn:
        attn_ref[...] = a.reshape(n_head, bt, lq, lk).astype(attn_ref.dtype)

    # One batched MXU matmul for all heads' context; rebuild (Bt*Lq, n_head*d_v) in regs.
    ctx_h = jnp.einsum('bqk,bkd->bqd', a.astype(cdt), vh, preferred_element_type=f32)
    ctx = jnp.concatenate([ctx_h[h * bt:(h + 1) * bt] for h in range(n_head)], axis=-1)
    ctx2 = ctx.reshape(bt * lq, n_head * d_v)

    # Output projection + residual + LayerNorm (biased variance, as nn.LayerNorm).
    o = jnp.dot(ctx2.astype(cdt), wfc_ref[...], preferred_element_type=f32) + bfc_ref[...]
    o = o + t2
    mu = jnp.mean(o, axis=-1, keepdims=True)
    var = jnp.mean(jnp.square(o - mu), axis=-1, keepdims=True)
    o1 = (o - mu) * jax.lax.rsqrt(var + eps) * g1_ref[...] + be1_ref[...]

    # Position-wise FFN (Conv1d k=1 -> ReLU -> Conv1d k=1) + residual + LayerNorm.
    hid = jnp.dot(o1.astype(cdt), w1_ref[...], preferred_element_type=f32) + b1_ref[...]
    hid = jnp.maximum(hid, jnp.float32(0.0))
    f = jnp.dot(hid.astype(cdt), w2_ref[...], preferred_element_type=f32) + b2_ref[...]
    f = f + o1
    mu2 = jnp.mean(f, axis=-1, keepdims=True)
    var2 = jnp.mean(jnp.square(f - mu2), axis=-1, keepdims=True)
    out = (f - mu2) * jax.lax.rsqrt(var2 + eps) * g2_ref[...] + be2_ref[...]

    if out_slab:   # lane-dense writeback when d_model is not a multiple of 128
        out_ref[...] = out.reshape(bt, lq * d_model).astype(out_ref.dtype)
    else:
        out_ref[...] = out.reshape(bt, lq, d_model).astype(out_ref.dtype)


_MATMUL_WEIGHTS = ('wq', 'wk', 'wv', 'wfc', 'w1', 'w2')
_LAYER_PARAM_ORDER = ('wq', 'bq', 'wk', 'bk', 'wv', 'bv', 'wfc', 'bfc', 'g1', 'be1',
                      'w1', 'b1', 'w2', 'b2', 'g2', 'be2')


def decoder_layer(tgt, src, mask, p, *, n_head, d_k, d_v, return_attn,
                  compute_dtype, block_b=None, eps=1e-5):
    """tgt: (B, Lq, D) queries; src: (B, Lk, D) keys/values; mask: (B, Lqm, Lk) or None
    with Lqm in {1, Lq}.  Returns (out (B, Lq, D), attn (n_head, B, Lq, Lk) or None)."""
    batch, lq, d_model = tgt.shape
    lk = src.shape[1]
    d_forward = p['w1'].shape[1]
    has_mask = mask is not None
    lqm = mask.shape[1] if has_mask else 1

    if block_b is None:
        bt = _pick_block_b(batch, lq, lk, lqm, d_model, d_forward, n_head, d_k, d_v,
                           compute_dtype)
        while batch % bt:        # standalone fallback; cmtr_forward pads instead
            bt -= 1
    else:
        bt = block_b
        assert batch % bt == 0, "pad the batch to a multiple of block_b (see cmtr_forward)"

    out_slab = _use_lane_dense_slab(lq, d_model, bt, batch)

    kernel = functools.partial(decoder_layer_kernel, n_head=n_head, d_k=d_k, d_v=d_v,
                               eps=eps, has_mask=has_mask, return_attn=return_attn,
                               compute_dtype=compute_dtype, out_slab=out_slab)

    operands = [tgt, src]
    in_specs = [pl.BlockSpec((bt, lq, d_model), lambda b: (b, 0, 0)),
                pl.BlockSpec((bt, lk, d_model), lambda b: (b, 0, 0))]
    if has_mask:
        operands.append(mask)
        in_specs.append(pl.BlockSpec((bt, lqm, lk), lambda b: (b, 0, 0)))

    # Grid-invariant weight specs (constant index_map, single buffer); matmul weights
    # pre-cast to the MXU compute dtype, biases / LN params stay f32.
    for name in _LAYER_PARAM_ORDER:
        arr = p[name]
        if name in _MATMUL_WEIGHTS:
            arr = arr.astype(compute_dtype)
        operands.append(arr)
        in_specs.append(_const_spec(arr.shape))

    out_specs, out_shape = [], []
    if out_slab:
        out_specs.append(pl.BlockSpec((bt, lq * d_model), lambda b: (b, 0)))
        out_shape.append(jax.ShapeDtypeStruct((batch, lq * d_model), tgt.dtype))
    else:
        out_specs.append(pl.BlockSpec((bt, lq, d_model), lambda b: (b, 0, 0)))
        out_shape.append(jax.ShapeDtypeStruct((batch, lq, d_model), tgt.dtype))
    if return_attn:
        attn_dtype = jnp.float32 if compute_dtype == jnp.float32 else jnp.bfloat16
        out_specs.append(pl.BlockSpec((n_head, bt, lq, lk), lambda b: (0, b, 0, 0)))
        out_shape.append(jax.ShapeDtypeStruct((n_head, batch, lq, lk), attn_dtype))

    res = pl.pallas_call(
        kernel,
        grid=(batch // bt,),
        in_specs=in_specs,
        out_specs=out_specs,
        out_shape=out_shape,
        compiler_params=_compiler_params(),
    )(*operands)

    out = res[0]
    if out_slab:
        out = out.reshape(batch, lq, d_model)      # free metadata reshape
    attn = res[1] if return_attn else None
    return out, attn


# ---------------------------------------------------------------------------
# full CMTr forward (eval mode)
# ---------------------------------------------------------------------------

def cmtr_forward(params, enc_input, enc_outputs_pos, tgt, *, mask=None,
                 return_attns=False, learnable_query=False,
                 n_head, d_k, d_v, compute_dtype=jnp.bfloat16):
    batch, lq = tgt.shape[0], tgt.shape[1]
    d_hidden = params['enc_emb_w'].shape[1]
    d_forward = params['layers'][0]['w1'].shape[1]

    # Sinusoid positional lookup (embedding gather) outside the kernel.
    src_pos = jnp.take(params['pos_table'], enc_outputs_pos, axis=0)
    src = embed(enc_input, src_pos, params['enc_emb_w'], params['enc_emb_b'],
                compute_dtype=compute_dtype)
    lk = src.shape[1]

    # learnable_query path: no positional add at all; otherwise pos_q is a (1, Lq, D)
    # constant-index operand (no B-sized HBM broadcast materialized).
    tgt_pos = None if learnable_query else params['pos_q']
    x = embed(tgt, tgt_pos, params['tgt_emb_w'], params['tgt_emb_b'],
              compute_dtype=compute_dtype)

    # Boolean-ize the mask in f32 first, then halve its HBM read with bf16 {0,1}.
    mask_k = None if mask is None else (mask > 0).astype(jnp.bfloat16)
    lqm = 1 if mask_k is None else mask_k.shape[1]

    # One batch block size for all layers; pad the batch once so odd batch sizes never
    # degrade to bt=1 grid steps.
    bt = _pick_block_b(batch, lq, lk, lqm, d_hidden, d_forward, n_head, d_k, d_v,
                       compute_dtype)
    batch_p = ((batch + bt - 1) // bt) * bt
    if batch_p != batch:
        pad = batch_p - batch
        x = jnp.pad(x, ((0, pad), (0, 0), (0, 0)))
        src = jnp.pad(src, ((0, pad), (0, 0), (0, 0)))
        if mask_k is not None:
            mask_k = jnp.pad(mask_k, ((0, pad), (0, 0), (0, 0)))

    attns = []
    for lp in params['layers']:
        x, attn = decoder_layer(x, src, mask_k, lp, n_head=n_head, d_k=d_k, d_v=d_v,
                                return_attn=return_attns, compute_dtype=compute_dtype,
                                block_b=bt)
        if return_attns:
            # head-major (n_head, B, Lq, Lk) -> PyTorch (n_head*B, Lq, Lk) layout.
            attns.append(attn[:, :batch].reshape(n_head * batch, lq, lk))
    x = x[:batch]
    if return_attns:
        return x, attns
    return x


# ---------------------------------------------------------------------------
# pure-JAX reference (mirrors the PyTorch forward, eval mode, f32)
# ---------------------------------------------------------------------------

def reference_cmtr(params, enc_input, enc_outputs_pos, tgt, *, mask=None,
                   return_attns=False, learnable_query=False,
                   n_head, d_k, d_v, eps=1e-5):
    src = (enc_input @ params['enc_emb_w'] + params['enc_emb_b']
           + jnp.take(params['pos_table'], enc_outputs_pos, axis=0))
    if learnable_query:
        x = tgt @ params['tgt_emb_w'] + params['tgt_emb_b']
    else:
        x = tgt @ params['tgt_emb_w'] + params['tgt_emb_b'] + params['pos_q']
    batch, lq, _ = x.shape
    lk = src.shape[1]

    def ln(y, g, b):
        mu = jnp.mean(y, -1, keepdims=True)
        var = jnp.mean(jnp.square(y - mu), -1, keepdims=True)
        return (y - mu) / jnp.sqrt(var + eps) * g + b

    attns = []
    for p in params['layers']:
        q = x @ p['wq'] + p['bq']
        k = src @ p['wk'] + p['bk']
        v = src @ p['wv'] + p['bv']
        qh = q.reshape(batch, lq, n_head, d_k).transpose(0, 2, 1, 3)
        kh = k.reshape(batch, lk, n_head, d_k).transpose(0, 2, 1, 3)
        vh = v.reshape(batch, lk, n_head, d_v).transpose(0, 2, 1, 3)
        s = jnp.einsum('bhqd,bhkd->bhqk', qh, kh) / np.sqrt(d_k)
        if mask is not None:
            s = jnp.where(mask[:, None] > 0, -1e30, s)
        a = jax.nn.softmax(s, axis=-1)
        ctx = jnp.einsum('bhqk,bhkd->bhqd', a, vh).transpose(0, 2, 1, 3)
        ctx = ctx.reshape(batch, lq, n_head * d_v)
        o = ln(ctx @ p['wfc'] + p['bfc'] + x, p['g1'], p['be1'])
        f = jnp.maximum(o @ p['w1'] + p['b1'], 0.0) @ p['w2'] + p['b2']
        x = ln(f + o, p['g2'], p['be2'])
        attns.append(a.transpose(1, 0, 2, 3).reshape(n_head * batch, lq, lk))
    if return_attns:
        return x, attns
    return x


# ---------------------------------------------------------------------------
# main: deterministic small-shape test
# ---------------------------------------------------------------------------

if __name__ == "__main__":
    B, Ls, Lq = 2, 16, 8
    d_in, d_hidden, d_out, d_forward = 24, 32, 16, 64
    n_layers, n_head, d_k, d_v = 2, 4, 8, 8
    max_seq_len = 32

    keys = iter(jax.random.split(jax.random.PRNGKey(0), 8 + n_layers * 16 + 4))
    nk = lambda: next(keys)

    def nrm(k, shape, scale):
        return scale * jax.random.normal(k, shape, jnp.float32)

    params = {
        'enc_emb_w': nrm(nk(), (d_in, d_hidden), np.sqrt(2.0 / (d_in + d_hidden))),
        'enc_emb_b': nrm(nk(), (1, d_hidden), 0.02),
        'tgt_emb_w': nrm(nk(), (d_out, d_hidden), np.sqrt(2.0 / (d_out + d_hidden))),
        'tgt_emb_b': nrm(nk(), (1, d_hidden), 0.02),
        'pos_q': nrm(nk(), (1, Lq, d_hidden), 0.05),
        'pos_table': get_sinusoid_encoding_table(max_seq_len + 1, d_hidden, padding_idx=0),
        'layers': [],
    }
    for _ in range(n_layers):
        params['layers'].append({
            'wq': nrm(nk(), (d_hidden, n_head * d_k), np.sqrt(2.0 / (d_hidden + d_k))),
            'bq': nrm(nk(), (1, n_head * d_k), 0.02),
            'wk': nrm(nk(), (d_hidden, n_head * d_k), np.sqrt(2.0 / (d_hidden + d_k))),
            'bk': nrm(nk(), (1, n_head * d_k), 0.02),
            'wv': nrm(nk(), (d_hidden, n_head * d_v), np.sqrt(2.0 / (d_hidden + d_v))),
            'bv': nrm(nk(), (1, n_head * d_v), 0.02),
            'wfc': nrm(nk(), (n_head * d_v, d_hidden), np.sqrt(2.0 / (n_head * d_v + d_hidden))),
            'bfc': nrm(nk(), (1, d_hidden), 0.02),
            'g1': 1.0 + nrm(nk(), (1, d_hidden), 0.1),
            'be1': nrm(nk(), (1, d_hidden), 0.1),
            'w1': nrm(nk(), (d_hidden, d_forward), np.sqrt(2.0 / (d_hidden + d_forward))),
            'b1': nrm(nk(), (1, d_forward), 0.02),
            'w2': nrm(nk(), (d_forward, d_hidden), np.sqrt(2.0 / (d_hidden + d_forward))),
            'b2': nrm(nk(), (1, d_hidden), 0.02),
            'g2': 1.0 + nrm(nk(), (1, d_hidden), 0.1),
            'be2': nrm(nk(), (1, d_hidden), 0.1),
        })

    enc_input = jax.random.normal(nk(), (B, Ls, d_in), jnp.float32)
    enc_outputs_pos = jnp.tile(jnp.arange(1, Ls + 1, dtype=jnp.int32)[None], (B, 1))
    tgt = jax.random.normal(nk(), (B, Lq, d_out), jnp.float32)
    # Key-padding style attention mask (1.0 = masked), passed compactly as (B, 1, Ls);
    # no row is fully masked.
    valid = jnp.array([Ls, Ls - 4], jnp.int32)
    mask = (jnp.arange(Ls)[None, None, :] >= valid[:, None, None]).astype(jnp.float32)

    # --- f32 compute path: validation against the pure-JAX reference ---
    out_f32, attns_f32 = cmtr_forward(params, enc_input, enc_outputs_pos, tgt,
                                      mask=mask, return_attns=True, learnable_query=False,
                                      n_head=n_head, d_k=d_k, d_v=d_v,
                                      compute_dtype=jnp.float32)
    out_f32 = jax.block_until_ready(out_f32)

    ref_out, ref_attns = reference_cmtr(params, enc_input, enc_outputs_pos, tgt,
                                        mask=mask, return_attns=True, learnable_query=False,
                                        n_head=n_head, d_k=d_k, d_v=d_v)

    assert out_f32.shape == (B, Lq, d_hidden)
    np.testing.assert_allclose(np.asarray(out_f32), np.asarray(ref_out),
                               atol=2e-2, rtol=2e-2)
    for a_k, a_r in zip(attns_f32, ref_attns):
        assert a_k.shape == (n_head * B, Lq, Ls)
        np.testing.assert_allclose(np.asarray(a_k), np.asarray(a_r),
                                   atol=2e-2, rtol=2e-2)

    # --- default bf16-MXU path (CMTr default: no attn outputs) — loose sanity check ---
    out_bf16 = cmtr_forward(params, enc_input, enc_outputs_pos, tgt,
                            mask=mask, return_attns=False, learnable_query=False,
                            n_head=n_head, d_k=d_k, d_v=d_v,
                            compute_dtype=jnp.bfloat16)
    out_bf16 = jax.block_until_ready(out_bf16)
    assert out_bf16.shape == (B, Lq, d_hidden)
    np.testing.assert_allclose(np.asarray(out_bf16), np.asarray(ref_out),
                               atol=1.5e-1, rtol=1.5e-1)

    print("KERNEL_OK")
</pallas_src>

<mosaic_0001>
module attributes {stable_mosaic.version = 11 : i64} {
  func.func @embed_kernel(%arg0: i32, %arg1: memref<2x16x24xf32, #tpu.memory_space<vmem>>, %arg2: memref<2x16x32xf32, #tpu.memory_space<vmem>>, %arg3: memref<24x32xf32, #tpu.memory_space<vmem>>, %arg4: memref<1x32xf32, #tpu.memory_space<vmem>>, %arg5: memref<2x512xf32, #tpu.memory_space<vmem>>) attributes {dimension_semantics = [#tpu.dimension_semantics<parallel>], iteration_bounds = array<i64: 1>, scalar_prefetch = 0 : i64, scratch_operands = 0 : i64, tpu.core_type = #tpu.core_type<tc>, window_params = [{transform_indices = @transform_0, window_bounds = array<i64: 2, 16, 24>}, {transform_indices = @transform_1, window_bounds = array<i64: 2, 16, 32>}, {pipeline_mode = #tpu.pipeline_mode<synchronous>, transform_indices = @transform_2, window_bounds = array<i64: 24, 32>}, {pipeline_mode = #tpu.pipeline_mode<synchronous>, transform_indices = @transform_3, window_bounds = array<i64: 1, 32>}, {transform_indices = @transform_4, window_bounds = array<i64: 2, 512>}]} {
    %c0 = arith.constant 0 : index
    %c0_0 = arith.constant 0 : index
    %c0_1 = arith.constant 0 : index
    %0 = vector.load %arg1[%c0, %c0_0, %c0_1] : memref<2x16x24xf32, #tpu.memory_space<vmem>>, vector<2x16x24xf32>
    %1 = vector.shape_cast %0 : vector<2x16x24xf32> to vector<32x24xf32>
    %c0_2 = arith.constant 0 : index
    %c0_3 = arith.constant 0 : index
    %2 = vector.load %arg3[%c0_2, %c0_3] : memref<24x32xf32, #tpu.memory_space<vmem>>, vector<24x32xf32>
    %cst = arith.constant dense<0.000000e+00> : vector<32x32xf32>
    %3 = tpu.matmul %1, %2, %cst {dimension_numbers = #tpu.dot_dimension_numbers<[1], [0], [0], [1], [0, 0, 1, 1], [], []>} : vector<32x24xf32>, vector<24x32xf32>, vector<32x32xf32> -> vector<32x32xf32>
    %c0_4 = arith.constant 0 : index
    %c0_5 = arith.constant 0 : index
    %4 = vector.load %arg4[%c0_4, %c0_5] : memref<1x32xf32, #tpu.memory_space<vmem>>, vector<1x32xf32>
    %5 = vector.broadcast %4 : vector<1x32xf32> to vector<32x32xf32>
    %6 = arith.addf %3, %5 : vector<32x32xf32>
    %7 = vector.shape_cast %6 : vector<32x32xf32> to vector<2x16x32xf32>
    %c0_6 = arith.constant 0 : index
    %c0_7 = arith.constant 0 : index
    %c0_8 = arith.constant 0 : index
    %8 = vector.load %arg2[%c0_6, %c0_7, %c0_8] : memref<2x16x32xf32, #tpu.memory_space<vmem>>, vector<2x16x32xf32>
    %9 = arith.addf %7, %8 : vector<2x16x32xf32>
    %10 = vector.shape_cast %9 : vector<2x16x32xf32> to vector<2x512xf32>
    %c0_9 = arith.constant 0 : index
    %c0_10 = arith.constant 0 : index
    %11 = vector.load %arg5[%c0_9, %c0_10] : memref<2x512xf32, #tpu.memory_space<vmem>>, vector<2x512xf32>
    tpu.vector_store %arg5[%c0_9, %c0_10], %10 {strides = array<i32>} : memref<2x512xf32, #tpu.memory_space<vmem>>, vector<2x512xf32>,
    return
  }
  func.func @transform_0(%arg0: i32) -> (i32, i32, i32) {
    %c0_i32 = arith.constant 0 : i32
    %c0_i32_0 = arith.constant 0 : i32
    %c0_i32_1 = arith.constant 0 : i32
    return %arg0, %c0_i32, %c0_i32_0 : i32, i32, i32
  }
  func.func @transform_1(%arg0: i32) -> (i32, i32, i32) {
    %c0_i32 = arith.constant 0 : i32
    %c0_i32_0 = arith.constant 0 : i32
    %c0_i32_1 = arith.constant 0 : i32
    return %arg0, %c0_i32, %c0_i32_0 : i32, i32, i32
  }
  func.func @transform_2(%arg0: i32) -> (i32, i32) {
    %c0_i32 = arith.constant 0 : i32
    %c0_i32_0 = arith.constant 0 : i32
    %c0_i32_1 = arith.constant 0 : i32
    return %c0_i32, %c0_i32_0 : i32, i32
  }
  func.func @transform_3(%arg0: i32) -> (i32, i32) {
    %c0_i32 = arith.constant 0 : i32
    %c0_i32_0 = arith.constant 0 : i32
    %c0_i32_1 = arith.constant 0 : i32
    return %c0_i32, %c0_i32_0 : i32, i32
  }
  func.func @transform_4(%arg0: i32) -> (i32, i32) {
    %c0_i32 = arith.constant 0 : i32
    %c0_i32_0 = arith.constant 0 : i32
    return %arg0, %c0_i32 : i32, i32
  }
}

</mosaic_0001>

<bundles_post_ra>
// kernel: tpu_custom_call.1
= control target key start
LH: loop header
LB: loop body
LE: loop exit
PB: predicated region body
PF: predicated region fallthrough
CT: control target
= control target key end

     0   :  { %9 = vsyncpa [#allocation3], 0  ;;  %s529_s0 = inlined_call_operand.hbm [shape: f32[2,16,24], index: 0, kind: input, shape index: {}]   ;;  %s530_s1 = inlined_call_operand.hbm [shape: f32[2,16,32], index: 1, kind: input, shape index: {}]   ;;  %s531_s2 = inlined_call_operand.hbm [shape: f32[24,32], index: 2, kind: input, shape index: {}]   ;;  %s532_s3 = inlined_call_operand.vmem [shape: f32[1,32], index: 3, kind: input, shape index: {}]   ;;  %s533_s4 = inlined_call_operand.hbm [shape: f32[2,512], index: 4, kind: output, shape index: {}]  }
   0x1   :  { %10 = vsyncpa [#allocation6], 0 }
   0x2   :  { %11 = vsyncpa [#allocation4], 0  ;;  %s29_s17 = sshll.u32 %s530_s1, 4  ;;  %s454_s18 = smov [#allocation5]   ;;  %s30_s17 = int_to_ptr.hbm [resolvable:$true] %s29_s17 }
   0x3   :  { %s31_s19 = sshll.u32 %s454_s18, 4  ;;  %s16_s22 = sshll.u32 %s529_s0, 4  ;;  %s32_s19 = int_to_ptr.vmem [resolvable:$true] %s31_s19  ;;  %s17_s22 = int_to_ptr.hbm [resolvable:$true] %s16_s22 }
   0x4   :  { %s455_s23 = smov 128   ;;  %s456_s24 = smov 8  }
   0x5   :  { %37 = dma.hbm_to_vmem [thread:$0]  %s30_s17, 512, %s32_s19, [#allocation6], %s455_s23, %s455_s23, %s456_s24  }
   0x6   :  { %s457_s25 = smov [#allocation2]   ;;  %s42_s29 = sshll.u32 %s531_s2, 4  ;;  %s43_s29 = int_to_ptr.hbm [resolvable:$true] %s42_s29 }
   0x7   :  { %s18_s26 = sshll.u32 %s457_s25, 4  ;;  %s458_s1 = smov [#allocation7]   ;;  %s19_s26 = int_to_ptr.vmem [resolvable:$true] %s18_s26 }
   0x8   :  { %24 = dma.hbm_to_vmem [thread:$0]  %s17_s22, 512, %s19_s26, [#allocation3], %s455_s23, %s455_s23, %s456_s24  }
   0x9   :  { %s44_s30 = sshll.u32 %s458_s1, 4  ;;  %s45_s30 = int_to_ptr.vmem [resolvable:$true] %s44_s30 }
   0xa   :  { %50 = dma.hbm_to_vmem [thread:$0]  %s43_s29, 384, %s45_s30, [#allocation6], %s455_s23, %s455_s23, %s456_s24  }
   0xb   :  { %448 = dma.done.wait [#allocation3], 512  }
   0xc   :  { %449 = vsyncadd [#allocation3], 4294966784 }
   0xd   :  { %450 = dma.done.wait [#allocation6], 896  }
   0xe   :  { %451 = vsyncadd [#allocation6], 4294966400  ;;  %v71_v0 = vld [vmem:[#allocation7 + $0x10] sm:$0xff]  ;;  %v70_v1 = vld [vmem:[#allocation7 + $0x8] sm:$0xff]  ;;  %vm76_vm0 = vcmask 195584   ;;  %vm127_vm1 = vcmask 1047556  }
   0xf   :  { %332 = vmatpush.msra.mxu2 %v71_v0  ;;  %333 = vmatpush.msra.mxu3 %v71_v0  ;;  %v69_v2 = vld [vmem:[#allocation7] sm:$0xff]  ;;  %v67_v3 = vld [vmem:[#allocation2 + $0x10] sm:$0xff]  ;;  %v68_v4 = vld [vmem:[#allocation2 + $0x18] sm:$0xff]  ;;  %v459_v8 = vmov 1983009808   ;;  %s462_s5 = smov 32  }
  0x10   :  { %102 = vmatpush.msra.mxu0 %v71_v0  ;;  %331 = vmatpush.msra.mxu1 %v71_v0  ;;  %v65_v5 = vld [vmem:[#allocation2] sm:$0xff]  ;;  %v66_v6 = vld [vmem:[#allocation2 + $0x8] sm:$0xff]  ;;  %v130_v9 = vunpack.c.l.s4 %v459_v8  ;;  %v120_v24 = vld [vmem:[#allocation5 + $0x10] sm:$0xff]  ;;  %v460_v26 = vmov 1934713408   ;;  %s463_s6 = smov 96  }
  0x11   :  { %335 = vmatpush.msra.mxu2 %v70_v1  ;;  %336 = vmatpush.msra.mxu3 %v70_v1  ;;  %v351_v7 = vld [vmem:[%s532_s3] ss:$0 sm:$0xff]  ;;  %v119_v13 = vld [vmem:[#allocation5 + $0x8] sm:$0xff]  ;;  %v121_v25 = vld [vmem:[#allocation5 + $0x18] sm:$0xff]  ;;  %v152_v27 = vunpack.c.l.s4 %v460_v26  ;;  %s461_s3 = smov 64   ;;  %vm279_vm2 = vcmask 261120  }
  0x12   :  { %103 = vmatpush.msra.mxu0 %v70_v1  ;;  %334 = vmatpush.msra.mxu1 %v70_v1  ;;  %v118_v11 = vld [vmem:[#allocation5] sm:$0xff]  ;;  %v131_v15 = vunpack.c.0.s8 %v130_v9  ;;  %vm281_vm3 = vcmask 523264   ;;  %vm283_vm4 = vcmask 785408   ;;  %vm301_vm5 = vcmask 1041408   ;;  %s464_s7 = smov [#allocation8]   ;;  %s316_s11 = sshll.u32 %s533_s4, 4  ;;  %s317_s11 = int_to_ptr.hbm [resolvable:$true] %s316_s11 }
  0x13   :  { %338 = vmatpush.msra.mxu2 %v69_v2  ;;  %339 = vmatpush.msra.mxu3 %v69_v2  ;;  %v153_v36 = vunpack.c.0.s8 %v152_v27  ;;  %vm303_vm6 = vcmask 1045508   ;;  %s314_s8 = sshll.u32 %s464_s7, 4  ;;  %vm305_vm7 = vcmask 1043456   ;;  %s315_s8 = int_to_ptr.vmem [resolvable:$true] %s314_s8 }
  0x14   :  { %329 = vmatmul.msk.f32.vlgmr.msra.gmra.mxu2 %vm76_vm0, %v67_v3  ;;  %330 = vmatmul.msk.f32.vlgmr.msra.gmra.mxu3 %vm76_vm0, %v68_v4 }
  0x15   :  { %104 = vmatpush.msra.mxu0 %v69_v2  ;;  %337 = vmatpush.msra.mxu1 %v69_v2 }
  0x16   :  { %327 = vmatmul.msk.f32.vlgmr.msra.gmra.mxu0 %vm76_vm0, %v65_v5  ;;  %328 = vmatmul.msk.f32.vlgmr.msra.gmra.mxu1 %vm76_vm0, %v66_v6 }
  0x93   :  { %v106_v10 = vpop.f32.mrf.mxu0  ;;  %v109_v12 = vpop.f32.mrf.mxu1 }
  0x94   :  { %v107_v14 = vadd.f32 %v351_v7, %v106_v10  ;;  %v110_v16 = vadd.f32 %v351_v7, %v109_v12 }
  0x96   :  { %v122_v17 = vadd.f32 %v118_v11, %v107_v14  ;;  %v123_v18 = vadd.f32 %v119_v13, %v110_v16 }
  0x97   :  { %v112_v19 = vpop.f32.mrf.mxu2  ;;  %v115_v20 = vpop.f32.mrf.mxu3 }
  0x98   :  { %v126_v21 = vrot.slane %v122_v17, 4  ;;  %v179_v22 = vrot.slane %v123_v18, 4  ;;  %v184_v23 = vperm.slane %v123_v18, %v131_v15  ;;  %v113_v28 = vadd.f32 %v351_v7, %v112_v19 }
  0x99   :  { %v116_v29 = vadd.f32 %v351_v7, %v115_v20  ;;  %v132_v41 = vperm.slane %v122_v17, %v131_v15 }
  0x9a   :  { %v128_v30 = vsel %vm127_vm1, 0.0, %v126_v21  ;;  %v180_v32 = vsel %vm127_vm1, 0.0, %v179_v22  ;;  %v124_v33 = vadd.f32 %v120_v24, %v113_v28  ;;  %v201_v35 = vrot.slane %v184_v23, 4 }
  0x9b   :  { %v136_v31 = vperm.slane %v128_v30, %v131_v15  ;;  %v125_v34 = vadd.f32 %v121_v25, %v116_v29  ;;  %v188_v42 = vperm.slane %v180_v32, %v131_v15  ;;  %v149_v4 = vrot.slane %v132_v41, 4 }
  0x9c   :  { %v137_v37 = vrot.slane %v124_v33, 4  ;;  %v142_v38 = vperm.slane %v124_v33, %v131_v15 }
  0x9d   :  { %v189_v39 = vrot.slane %v125_v34, 4  ;;  %v194_v40 = vperm.slane %v125_v34, %v131_v15  ;;  %v161_v43 = vrot.slane %v136_v31, 4  ;;  %v213_v55 = vrot.slane %v188_v42, 4 }
  0x9e   :  { %v138_v44 = vsel %vm127_vm1, 0.0, %v137_v37  ;;  %v147_v45 = vrot.slane %v142_v38, 4  ;;  %v150_v11 = vsel %vm127_vm1, %v142_v38, %v149_v4 }
  0x9f   :  { %v190_v46 = vsel %vm127_vm1, 0.0, %v189_v39  ;;  %v199_v47 = vrot.slane %v194_v40, 4  ;;  %v202_v48 = vsel %vm127_vm1, %v194_v40, %v201_v35  ;;  %v146_v49 = vperm.slane %v138_v44, %v131_v15 }
  0xa0   :  { %v198_v50 = vperm.slane %v190_v46, %v131_v15  ;;  %v210_v51 = vperm.slane %v202_v48, %v153_v36  ;;  %v148_v57 = vsel %vm127_vm1, %v147_v45, %v132_v41  ;;  %v158_v15 = vperm.slane %v150_v11, %v153_v36 }
  0xa1   :  { %v200_v52 = vsel %vm127_vm1, %v199_v47, %v184_v23  ;;  %v162_v53 = vsel %vm127_vm1, %v146_v49, %v161_v43  ;;  %v154_v62 = vperm.slane %v148_v57, %v153_v36  ;;  %v159_v63 = vrot.slane %v146_v49, 4 }
  0xa2   :  { %v206_v54 = vperm.slane %v200_v52, %v153_v36  ;;  %260 = vrot.lane.b32.xlu2 %v210_v51, %s461_s3  ;;  %v170_v56 = vperm.slane %v162_v53, %v153_v36  ;;  %v211_v59 = vrot.slane %v198_v50, 4  ;;  %v214_v61 = vsel %vm127_vm1, %v198_v50, %v213_v55 }
  0xa3   :  { %v222_v1 = vperm.slane %v214_v61, %v153_v36  ;;  %v171_v3 = vrot.slane %v154_v62, 4  ;;  %v160_v5 = vsel %vm127_vm1, %v159_v63, %v136_v31  ;;  %v225_v8 = vrot.slane %v210_v51, 4 }
  0xa4   :  { %v223_v58 = vrot.slane %v206_v54, 4  ;;  %248 = vrot.lane.b32.xlu1 %v170_v56, %s461_s3  ;;  %v177_v0 = vrot.slane %v170_v56, 4  ;;  %v212_v2 = vsel %vm127_vm1, %v211_v59, %v188_v42  ;;  %v166_v10 = vperm.slane %v160_v5, %v153_v36 }
  0xa5   :  { %v218_v7 = vperm.slane %v212_v2, %v153_v36  ;;  %v172_v9 = vsel %vm127_vm1, 0.0, %v171_v3  ;;  %v226_v13 = vsel %vm127_vm1, 0.0, %v225_v8  ;;  %v173_v18 = vrot.slane %v158_v15, 4 }
  0xa6   :  { %v224_v60 = vsel %vm127_vm1, 0.0, %v223_v58  ;;  %v178_v6 = vsel %vm127_vm1, 0.0, %v177_v0  ;;  %v175_v14 = vrot.slane %v166_v10, 4  ;;  %v229_v20 = vrot.slane %v222_v1, 4 }
  0xa7   :  { %256 = vrot.lane.b32.xlu0 %v224_v60, %s462_s5  ;;  %v227_v12 = vrot.slane %v218_v7, 4  ;;  %v174_v19 = vsel %vm127_vm1, 0.0, %v173_v18 }
  0xa8   :  { %v176_v17 = vsel %vm127_vm1, 0.0, %v175_v14  ;;  %v230_v21 = vsel %vm127_vm1, 0.0, %v229_v20 }
  0xa9   :  { %v228_v16 = vsel %vm127_vm1, 0.0, %v227_v12 }
  0xaa   :  { %272 = vrot.lane.b32.xlu2 %v222_v1, %s461_s3 }
  0xac   :  { %252 = vrot.lane.b32.xlu1 %v178_v6, %s463_s6 }
  0xaf   :  { %232 = vrot.lane.b32.xlu0 %v172_v9, %s462_s5 }
  0xb2   :  { %264 = vrot.lane.b32.xlu2 %v226_v13, %s463_s6 }
  0xb4   :  { %268 = vrot.lane.b32.xlu1 %v228_v16, %s462_s5 }
  0xb7   :  { %244 = vrot.lane.b32.xlu0 %v176_v17, %s462_s5 }
  0xba   :  { %240 = vrot.lane.b32.xlu2 %v174_v19, %s463_s6 }
  0xbc   :  { %236 = vrot.lane.b32.xlu1 %v158_v15, %s461_s3 }
  0xbf   :  { %276 = vrot.lane.b32.xlu0 %v230_v21, %s463_s6 }
  0xfc   :  { %v261_v22 = vpop.permute.xlu2 %260 }
 0x104   :  { %v273_v25 = vpop.permute.xlu2 %272 }
 0x10c   :  { %v265_v28 = vpop.permute.xlu2 %264 }
 0x114   :  { %v241_v41 = vpop.permute.xlu2 %240 }
 0x116   :  { %v249_v23 = vpop.permute.xlu1 %248 }
 0x119   :  { %v257_v24 = vpop.permute.xlu0 %256 }
 0x11a   :  { %v288_v31 = vsel %vm279_vm2, %v206_v54, %v257_v24 }
 0x11b   :  { %v289_v33 = vsel %vm281_vm3, %v288_v31, %v261_v22 }
 0x11c   :  { %v290_v40 = vsel %vm283_vm4, %v289_v33, %v265_v28 }
 0x11d   :  { %v299_v48 = vrot.slane %v290_v40, 4 }
 0x11e   :  { %v253_v26 = vpop.permute.xlu1 %252 }
 0x121   :  { %v233_v27 = vpop.permute.xlu0 %232 }
 0x122   :  { %v280_v36 = vsel %vm279_vm2, %v154_v62, %v233_v27 }
 0x126   :  { %v269_v29 = vpop.permute.xlu1 %268 }
 0x127   :  { %v291_v35 = vsel %vm279_vm2, %v218_v7, %v269_v29 }
 0x128   :  { %v292_v42 = vsel %vm281_vm3, %v291_v35, %v273_v25 }
 0x129   :  { %v245_v30 = vpop.permute.xlu0 %244 }
 0x12a   :  { %v285_v32 = vsel %vm279_vm2, %v166_v10, %v245_v30 }
 0x12b   :  { %v286_v34 = vsel %vm281_vm3, %v285_v32, %v249_v23 }
 0x12c   :  { %v287_v39 = vsel %vm283_vm4, %v286_v34, %v253_v26 }
 0x12d   :  { %v298_v46 = vrot.slane %v287_v39, 6 }
 0x12e   :  { %v237_v37 = vpop.permute.xlu1 %236 }
 0x12f   :  { %v282_v38 = vsel %vm281_vm3, %v280_v36, %v237_v37 }
 0x130   :  { %v284_v44 = vsel %vm283_vm4, %v282_v38, %v241_v41 }
 0x131   :  { %v277_v43 = vpop.permute.xlu0 %276  ;;  %v302_v49 = vsel %vm301_vm5, %v284_v44, %v298_v46 }
 0x132   :  { %v293_v45 = vsel %vm283_vm4, %v292_v42, %v277_v43 }
 0x133   :  { %v300_v47 = vrot.slane %v293_v45, 2 }
 0x135   :  { %v304_v50 = vsel %vm303_vm6, %v299_v48, %v300_v47 }
 0x136   :  { %v306_v51 = vsel %vm305_vm7, %v302_v49, %v304_v50 }
 0x137   :  { %308 = vst [vmem:[#allocation8] sm:$0xff] %v306_v51 }
 0x138   :  { %319 = dma.vmem_to_hbm [thread:$0]  %s315_s8, 128, %s317_s11, [#allocation4]  }
 0x139   :  { %452 = dma.done.wait [#allocation4], 128  }
 0x13a   :  { %453 = vsyncadd [#allocation4], 4294967168 }
 0x13b   :  { %324 = vsyncpa [#allocation3], 1 }
 0x13c   :  { %325 = vsyncpa [#allocation6], 1 }
 0x13d   :  { %326 = vsyncpa [#allocation4], 1 }

</bundles_post_ra>
